<compile_context>
chip_gen: v7x
topology: tpu7x:2x2x1
jax: 0.10.0
libtpu: 0.0.40
codegen_flags: <defaults>
</compile_context>

<pallas_src>
import functools

import jax
import jax.numpy as jnp
from jax.experimental import pallas as pl
from jax.experimental.pallas import tpu as pltpu

K = 3  # kernel_size
S = 3  # stride (PyTorch MaxPool2d default: stride = kernel_size)

# Max lanes per grid step: 2 * (H*W + OH*OW) * TB * 4B ~= 1.9 MB at TB=8192 for the
# 5x5 case -> fits v5e/v6e/v7x scoped VMEM with double buffering, multiple of 128.
TB_MAX = 8192


def _ceil_out(dim, k, s):
    # ceil((dim - k) / s) + 1   (ceil_mode=True, padding=0)
    return -(-(dim - k) // s) + 1


def maxpool_kernel(x_ref, o_ref, *, H, W, OH, OW):
    """x_ref: (H*W, TB) VMEM tile; o_ref: (OH*OW, TB).  Batch (N*C) is on lanes."""
    rows = []
    for oh in range(OH):                      # static, tiny (OH = 2 for 5x5)
        h0 = oh * S
        h1 = min(h0 + K, H)                   # ceil_mode: clip window at bottom edge
        for ow in range(OW):                  # static, tiny (OW = 2 for 5x5)
            w0 = ow * S
            w1 = min(w0 + K, W)               # ceil_mode: clip window at right edge
            acc = x_ref[pl.ds(h0 * W + w0, 1), :]              # (1, TB), lane-dense
            for h in range(h0, h1):
                for w in range(w0, w1):
                    if h == h0 and w == w0:
                        continue
                    acc = jnp.maximum(acc, x_ref[pl.ds(h * W + w, 1), :])
            rows.append(acc)
    # Single full-tile store (no per-row masked partial stores).
    o_ref[...] = jnp.concatenate(rows, axis=0)


def max_pool2d_ceil(x, *, tb_max=TB_MAX):
    """MaxPool2d(kernel_size=3, stride=3, padding=0, ceil_mode=True) on NCHW input."""
    N, C, H, W = x.shape
    OH = _ceil_out(H, K, S)
    OW = _ceil_out(W, K, S)
    B = N * C

    # Re-layout so the batch axis is lane-dense: (N, C, H, W) -> (H*W, B).
    # Pure layout plumbing; all pooling compute happens inside the kernel.
    x2 = jnp.transpose(jnp.reshape(x, (B, H * W)))             # (H*W, B)

    # Lane-block size: full B when small (block dim == full array dim is legal),
    # otherwise a 128-multiple tile; cdiv grid handles a ragged final block.
    tb = B if B <= tb_max else tb_max
    grid = (pl.cdiv(B, tb),)

    kernel = functools.partial(maxpool_kernel, H=H, W=W, OH=OH, OW=OW)
    out2 = pl.pallas_call(
        kernel,
        out_shape=jax.ShapeDtypeStruct((OH * OW, B), x.dtype),
        grid=grid,
        in_specs=[pl.BlockSpec((H * W, tb), lambda b: (0, b))],
        out_specs=pl.BlockSpec((OH * OW, tb), lambda b: (0, b)),
        compiler_params=pltpu.CompilerParams(dimension_semantics=("parallel",)),
    )(x2)

    # (OH*OW, B) -> (N, C, OH, OW)
    return jnp.reshape(jnp.transpose(out2), (N, C, OH, OW))
    # TODO(synk): for truly tiny inputs (a few hundred bytes) a production dispatcher
    # should fall back to lax.reduce_window so XLA can fuse it and skip launch cost.


def _reference(x):
    """Pure-JAX reference: ceil_mode == right-pad to full windows with -inf (floats)."""
    N, C, H, W = x.shape
    OH = _ceil_out(H, K, S)
    OW = _ceil_out(W, K, S)
    Hp = (OH - 1) * S + K
    Wp = (OW - 1) * S + K
    return jax.lax.reduce_window(
        x,
        -jnp.inf,
        jax.lax.max,
        window_dimensions=(1, 1, K, K),
        window_strides=(1, 1, S, S),
        padding=((0, 0), (0, 0), (0, Hp - H), (0, Wp - W)),
    )


if __name__ == "__main__":
    key = jax.random.PRNGKey(0)
    k_small, k_big = jax.random.split(key)

    # Mirrors `torch.reshape(input, (-1, 1, 5, 5))` with a small batch of 2.
    flat = jax.random.normal(k_small, (2 * 1 * 5 * 5,), dtype=jnp.float32)
    x = jnp.reshape(flat, (-1, 1, 5, 5))                       # (2, 1, 5, 5)
    out = jax.block_until_ready(max_pool2d_ceil(x))
    assert out.shape == (2, 1, 2, 2), out.shape
    assert jnp.allclose(out, _reference(x)), "small-batch mismatch"

    # Larger batch exercising the multi-block lane tiling (3 full blocks of 128 lanes).
    flat_big = jax.random.normal(k_big, (384 * 1 * 5 * 5,), dtype=jnp.float32)
    x_big = jnp.reshape(flat_big, (-1, 1, 5, 5))               # (384, 1, 5, 5)
    out_big = jax.block_until_ready(max_pool2d_ceil(x_big, tb_max=128))
    assert out_big.shape == (384, 1, 2, 2), out_big.shape
    assert jnp.allclose(out_big, _reference(x_big)), "large-batch mismatch"

    print("KERNEL_OK")
</pallas_src>

<mosaic_0001>
module attributes {stable_mosaic.version = 11 : i64} {
  func.func @maxpool_kernel(%arg0: i32, %arg1: memref<25x2xf32, #tpu.memory_space<vmem>>, %arg2: memref<4x2xf32, #tpu.memory_space<vmem>>) attributes {dimension_semantics = [#tpu.dimension_semantics<parallel>], iteration_bounds = array<i64: 1>, scalar_prefetch = 0 : i64, scratch_operands = 0 : i64, tpu.core_type = #tpu.core_type<tc>, window_params = [{transform_indices = @transform_0, window_bounds = array<i64: 25, 2>}, {transform_indices = @transform_1, window_bounds = array<i64: 4, 2>}]} {
    %c0 = arith.constant 0 : index
    %c0_0 = arith.constant 0 : index
    %0 = vector.load %arg1[%c0, %c0_0] : memref<25x2xf32, #tpu.memory_space<vmem>>, vector<1x2xf32>
    %c1 = arith.constant 1 : index
    %c0_1 = arith.constant 0 : index
    %1 = vector.load %arg1[%c1, %c0_1] : memref<25x2xf32, #tpu.memory_space<vmem>>, vector<1x2xf32>
    %2 = arith.maximumf %0, %1 : vector<1x2xf32>
    %c2 = arith.constant 2 : index
    %c0_2 = arith.constant 0 : index
    %3 = vector.load %arg1[%c2, %c0_2] : memref<25x2xf32, #tpu.memory_space<vmem>>, vector<1x2xf32>
    %4 = arith.maximumf %2, %3 : vector<1x2xf32>
    %c5 = arith.constant 5 : index
    %c0_3 = arith.constant 0 : index
    %5 = vector.load %arg1[%c5, %c0_3] : memref<25x2xf32, #tpu.memory_space<vmem>>, vector<1x2xf32>
    %6 = arith.maximumf %4, %5 : vector<1x2xf32>
    %c6 = arith.constant 6 : index
    %c0_4 = arith.constant 0 : index
    %7 = vector.load %arg1[%c6, %c0_4] : memref<25x2xf32, #tpu.memory_space<vmem>>, vector<1x2xf32>
    %8 = arith.maximumf %6, %7 : vector<1x2xf32>
    %c7 = arith.constant 7 : index
    %c0_5 = arith.constant 0 : index
    %9 = vector.load %arg1[%c7, %c0_5] : memref<25x2xf32, #tpu.memory_space<vmem>>, vector<1x2xf32>
    %10 = arith.maximumf %8, %9 : vector<1x2xf32>
    %c10 = arith.constant 10 : index
    %c0_6 = arith.constant 0 : index
    %11 = vector.load %arg1[%c10, %c0_6] : memref<25x2xf32, #tpu.memory_space<vmem>>, vector<1x2xf32>
    %12 = arith.maximumf %10, %11 : vector<1x2xf32>
    %c11 = arith.constant 11 : index
    %c0_7 = arith.constant 0 : index
    %13 = vector.load %arg1[%c11, %c0_7] : memref<25x2xf32, #tpu.memory_space<vmem>>, vector<1x2xf32>
    %14 = arith.maximumf %12, %13 : vector<1x2xf32>
    %c12 = arith.constant 12 : index
    %c0_8 = arith.constant 0 : index
    %15 = vector.load %arg1[%c12, %c0_8] : memref<25x2xf32, #tpu.memory_space<vmem>>, vector<1x2xf32>
    %16 = arith.maximumf %14, %15 : vector<1x2xf32>
    %c3 = arith.constant 3 : index
    %c0_9 = arith.constant 0 : index
    %17 = vector.load %arg1[%c3, %c0_9] : memref<25x2xf32, #tpu.memory_space<vmem>>, vector<1x2xf32>
    %c4 = arith.constant 4 : index
    %c0_10 = arith.constant 0 : index
    %18 = vector.load %arg1[%c4, %c0_10] : memref<25x2xf32, #tpu.memory_space<vmem>>, vector<1x2xf32>
    %19 = arith.maximumf %17, %18 : vector<1x2xf32>
    %c8 = arith.constant 8 : index
    %c0_11 = arith.constant 0 : index
    %20 = vector.load %arg1[%c8, %c0_11] : memref<25x2xf32, #tpu.memory_space<vmem>>, vector<1x2xf32>
    %21 = arith.maximumf %19, %20 : vector<1x2xf32>
    %c9 = arith.constant 9 : index
    %c0_12 = arith.constant 0 : index
    %22 = vector.load %arg1[%c9, %c0_12] : memref<25x2xf32, #tpu.memory_space<vmem>>, vector<1x2xf32>
    %23 = arith.maximumf %21, %22 : vector<1x2xf32>
    %c13 = arith.constant 13 : index
    %c0_13 = arith.constant 0 : index
    %24 = vector.load %arg1[%c13, %c0_13] : memref<25x2xf32, #tpu.memory_space<vmem>>, vector<1x2xf32>
    %25 = arith.maximumf %23, %24 : vector<1x2xf32>
    %c14 = arith.constant 14 : index
    %c0_14 = arith.constant 0 : index
    %26 = vector.load %arg1[%c14, %c0_14] : memref<25x2xf32, #tpu.memory_space<vmem>>, vector<1x2xf32>
    %27 = arith.maximumf %25, %26 : vector<1x2xf32>
    %c15 = arith.constant 15 : index
    %c0_15 = arith.constant 0 : index
    %28 = vector.load %arg1[%c15, %c0_15] : memref<25x2xf32, #tpu.memory_space<vmem>>, vector<1x2xf32>
    %c16 = arith.constant 16 : index
    %c0_16 = arith.constant 0 : index
    %29 = vector.load %arg1[%c16, %c0_16] : memref<25x2xf32, #tpu.memory_space<vmem>>, vector<1x2xf32>
    %30 = arith.maximumf %28, %29 : vector<1x2xf32>
    %c17 = arith.constant 17 : index
    %c0_17 = arith.constant 0 : index
    %31 = vector.load %arg1[%c17, %c0_17] : memref<25x2xf32, #tpu.memory_space<vmem>>, vector<1x2xf32>
    %32 = arith.maximumf %30, %31 : vector<1x2xf32>
    %c20 = arith.constant 20 : index
    %c0_18 = arith.constant 0 : index
    %33 = vector.load %arg1[%c20, %c0_18] : memref<25x2xf32, #tpu.memory_space<vmem>>, vector<1x2xf32>
    %34 = arith.maximumf %32, %33 : vector<1x2xf32>
    %c21 = arith.constant 21 : index
    %c0_19 = arith.constant 0 : index
    %35 = vector.load %arg1[%c21, %c0_19] : memref<25x2xf32, #tpu.memory_space<vmem>>, vector<1x2xf32>
    %36 = arith.maximumf %34, %35 : vector<1x2xf32>
    %c22 = arith.constant 22 : index
    %c0_20 = arith.constant 0 : index
    %37 = vector.load %arg1[%c22, %c0_20] : memref<25x2xf32, #tpu.memory_space<vmem>>, vector<1x2xf32>
    %38 = arith.maximumf %36, %37 : vector<1x2xf32>
    %c18 = arith.constant 18 : index
    %c0_21 = arith.constant 0 : index
    %39 = vector.load %arg1[%c18, %c0_21] : memref<25x2xf32, #tpu.memory_space<vmem>>, vector<1x2xf32>
    %c19 = arith.constant 19 : index
    %c0_22 = arith.constant 0 : index
    %40 = vector.load %arg1[%c19, %c0_22] : memref<25x2xf32, #tpu.memory_space<vmem>>, vector<1x2xf32>
    %41 = arith.maximumf %39, %40 : vector<1x2xf32>
    %c23 = arith.constant 23 : index
    %c0_23 = arith.constant 0 : index
    %42 = vector.load %arg1[%c23, %c0_23] : memref<25x2xf32, #tpu.memory_space<vmem>>, vector<1x2xf32>
    %43 = arith.maximumf %41, %42 : vector<1x2xf32>
    %c24 = arith.constant 24 : index
    %c0_24 = arith.constant 0 : index
    %44 = vector.load %arg1[%c24, %c0_24] : memref<25x2xf32, #tpu.memory_space<vmem>>, vector<1x2xf32>
    %45 = arith.maximumf %43, %44 : vector<1x2xf32>
    %46 = tpu.concatenate %16, %27, %38, %45 in 0 : vector<1x2xf32>, vector<1x2xf32>, vector<1x2xf32>, vector<1x2xf32> -> vector<4x2xf32>
    %c0_25 = arith.constant 0 : index
    %c0_26 = arith.constant 0 : index
    %47 = vector.load %arg2[%c0_25, %c0_26] : memref<4x2xf32, #tpu.memory_space<vmem>>, vector<4x2xf32>
    tpu.vector_store %arg2[%c0_25, %c0_26], %46 {strides = array<i32>} : memref<4x2xf32, #tpu.memory_space<vmem>>, vector<4x2xf32>,
    return
  }
  func.func @transform_0(%arg0: i32) -> (i32, i32) {
    %c0_i32 = arith.constant 0 : i32
    %c0_i32_0 = arith.constant 0 : i32
    return %c0_i32, %arg0 : i32, i32
  }
  func.func @transform_1(%arg0: i32) -> (i32, i32) {
    %c0_i32 = arith.constant 0 : i32
    %c0_i32_0 = arith.constant 0 : i32
    return %c0_i32, %arg0 : i32, i32
  }
}

</mosaic_0001>

<bundles_post_ra>
// kernel: tpu_custom_call.1
= control target key start
LH: loop header
LB: loop body
LE: loop exit
PB: predicated region body
PF: predicated region fallthrough
CT: control target
= control target key end

     0   :  { %vm63_vm0 = vcmask 1040384   ;;  %vm65_vm1 = vcmask 1041408   ;;  %vm67_vm2 = vcmask 1042432   ;;  %vm69_vm3 = vcmask 11264   ;;  %s163_s0 = inlined_call_operand.vmem [shape: f32[25,2], index: 0, kind: input, shape index: {}]   ;;  %s164_s1 = inlined_call_operand.vmem [shape: f32[4,2], index: 1, kind: output, shape index: {}]  }
   0x1   :  { %v8_v0 = vld [vmem:[%s163_s0] sm:$0x1]  ;;  %v9_v1 = vld [vmem:[%s163_s0 + $0x1] sm:$0x1]  ;;  %v11_v2 = vld [vmem:[%s163_s0 + $0x2] sm:$0x1] }
   0x2   :  { %v10_v3 = vmax.f32 %v8_v0, %v9_v1  ;;  %v13_v4 = vld [vmem:[%s163_s0 + $0x5] sm:$0x1]  ;;  %v25_v6 = vld [vmem:[%s163_s0 + $0x3] sm:$0x1]  ;;  %v26_v7 = vld [vmem:[%s163_s0 + $0x4] sm:$0x1] }
   0x3   :  { %v28_v8 = vld [vmem:[%s163_s0 + $0x8] sm:$0x1]  ;;  %v15_v9 = vld [vmem:[%s163_s0 + $0x6] sm:$0x1]  ;;  %v27_v10 = vmax.f32 %v25_v6, %v26_v7  ;;  %v30_v11 = vld [vmem:[%s163_s0 + $0x9] sm:$0x1] }
   0x4   :  { %v12_v5 = vmax.f32 %v10_v3, %v11_v2  ;;  %v36_v13 = vld [vmem:[%s163_s0 + $0xf] sm:$0x1]  ;;  %v37_v14 = vld [vmem:[%s163_s0 + $0x10] sm:$0x1]  ;;  %v39_v15 = vld [vmem:[%s163_s0 + $0x11] sm:$0x1] }
   0x5   :  { %v17_v16 = vld [vmem:[%s163_s0 + $0x7] sm:$0x1]  ;;  %v29_v17 = vmax.f32 %v27_v10, %v28_v8  ;;  %v32_v18 = vld [vmem:[%s163_s0 + $0xd] sm:$0x1]  ;;  %v38_v19 = vmax.f32 %v36_v13, %v37_v14  ;;  %v41_v20 = vld [vmem:[%s163_s0 + $0x14] sm:$0x1] }
   0x6   :  { %v14_v12 = vmax.f32 %v12_v5, %v13_v4  ;;  %v47_v22 = vld [vmem:[%s163_s0 + $0x12] sm:$0x1]  ;;  %v48_v23 = vld [vmem:[%s163_s0 + $0x13] sm:$0x1]  ;;  %v50_v24 = vld [vmem:[%s163_s0 + $0x17] sm:$0x1] }
   0x7   :  { %v19_v25 = vld [vmem:[%s163_s0 + $0xa] sm:$0x1]  ;;  %v31_v26 = vmax.f32 %v29_v17, %v30_v11  ;;  %v40_v27 = vmax.f32 %v38_v19, %v39_v15  ;;  %v49_v28 = vmax.f32 %v47_v22, %v48_v23  ;;  %v34_v30 = vld [vmem:[%s163_s0 + $0xe] sm:$0x1]  ;;  %v43_v31 = vld [vmem:[%s163_s0 + $0x15] sm:$0x1] }
   0x8   :  { %v16_v21 = vmax.f32 %v14_v12, %v15_v9  ;;  %v52_v32 = vld [vmem:[%s163_s0 + $0x18] sm:$0x1]  ;;  %v21_v33 = vld [vmem:[%s163_s0 + $0xb] sm:$0x1]  ;;  %v45_v38 = vld [vmem:[%s163_s0 + $0x16] sm:$0x1] }
   0x9   :  { %v33_v34 = vmax.f32 %v31_v26, %v32_v18  ;;  %v42_v35 = vmax.f32 %v40_v27, %v41_v20  ;;  %v51_v36 = vmax.f32 %v49_v28, %v50_v24  ;;  %v23_v39 = vld [vmem:[%s163_s0 + $0xc] sm:$0x1] }
   0xa   :  { %v18_v29 = vmax.f32 %v16_v21, %v17_v16 }
   0xb   :  { %v35_v40 = vmax.f32 %v33_v34, %v34_v30  ;;  %v44_v41 = vmax.f32 %v42_v35, %v43_v31  ;;  %v53_v42 = vmax.f32 %v51_v36, %v52_v32 }
   0xc   :  { %v20_v37 = vmax.f32 %v18_v29, %v19_v25 }
   0xd   :  { %v46_v44 = vmax.f32 %v44_v41, %v45_v38  ;;  %v55_v45 = vrot.slane %v35_v40, 7  ;;  %v61_v47 = vrot.slane %v53_v42, 5 }
   0xe   :  { %v22_v43 = vmax.f32 %v20_v37, %v21_v33 }
   0xf   :  { %v58_v48 = vrot.slane %v46_v44, 6 }
  0x10   :  { %v24_v46 = vmax.f32 %v22_v43, %v23_v39 }
  0x12   :  { %v64_v49 = vsel %vm63_vm0, %v24_v46, %v55_v45 }
  0x13   :  { %v66_v50 = vsel %vm65_vm1, %v64_v49, %v58_v48 }
  0x14   :  { %v68_v51 = vsel %vm67_vm2, %v66_v50, %v61_v47 }
  0x15   :  { %70 = vst.msk [vmem:[%s164_s1] sm:$0xf] %vm69_vm3, %v68_v51 }

</bundles_post_ra>
